<compile_context>
chip_gen: v6e
topology: v6e:2x2x1
jax: 0.10.0
libtpu: 0.0.40
codegen_flags: <defaults>
</compile_context>

<pallas_src>
import functools

import jax
import jax.numpy as jnp
from jax.experimental import pallas as pl
from jax.experimental.pallas import tpu as pltpu

EPS = 1e-5          # nn.BatchNorm2d default
LANE = 128
SUBLANE = 8


def _vmem_limit_bytes():
    """~75% of physical VMEM, capped at 96 MiB (v5e/v6e -> 96 MiB, v7x -> 48 MiB)."""
    try:
        cap = int(pltpu.get_tpu_info().vmem_capacity_bytes)
    except Exception:
        cap = 64 * 1024 * 1024          # conservative fallback (v7x-sized)
    return min((cap * 3) // 4, 96 * 1024 * 1024)


def _pick_oh_tile(OH, Wp, C2p, row_cap, acc_bytes_cap):
    """Largest divisor TOH of OH with TOH*Wp <= row_cap and f32 acc under budget."""
    best = 1
    for t in range(1, OH + 1):
        if OH % t:
            continue
        tm = t * Wp
        if tm <= row_cap and tm * C2p * 4 <= acc_bytes_cap:
            best = t
    return best


def _conv_stats_kernel(x_ref, w_ref, y_ref, stats_ref, *, k, Wp, OW, TOH):
    """Pass 1: VALID conv as k kh-tap matmuls (kw folded into the contraction) plus
    per-image BatchNorm partial sums reduced on the MXU.

    x_ref:     (1, H*Wp, k*C1)    bf16, one whole image, resident across the row-tile axis
    w_ref:     (k, k*C1, C2p)     bf16, resident across the whole grid
    y_ref:     (1, TOH, Wp, C2p)  conv slab tile (bf16), row stride Wp
    stats_ref: (1, 2, C2p)        f32 per-image [sum; sum-of-squares] accumulator
    """
    m = pl.program_id(1)
    TM = TOH * Wp
    c2p = y_ref.shape[-1]

    @pl.when(m == 0)
    def _init():
        stats_ref[...] = jnp.zeros_like(stats_ref)

    row0 = m * TM
    acc = jnp.zeros((TM, c2p), jnp.float32)
    # Output position j = oh*Wp + ow; tap kh reads folded-input row kh*Wp + j whose lanes
    # already hold the k kw-shifted channel groups -> one matmul per kh with K = k*C1 over a
    # sublane-aligned (multiple-of-8) window of the VMEM-resident image block.
    for kh in range(k):
        start = pl.multiple_of(row0 + kh * Wp, SUBLANE)
        lhs = x_ref[0, pl.ds(start, TM), :]                      # (TM, k*C1) bf16
        acc = acc + jnp.dot(lhs, w_ref[kh], preferred_element_type=jnp.float32)

    y_ref[0] = acc.reshape(TOH, Wp, c2p).astype(y_ref.dtype)

    # BN partial stats: mask the Wp-OW wrap columns (j % Wp >= OW) and reduce rows on the
    # MXU (masked ones-vector matmuls) instead of a VPU mask pass + XLU reductions.
    col = jax.lax.broadcasted_iota(jnp.int32, (SUBLANE, TM), 1) % Wp
    mask = (col < OW).astype(jnp.float32)                        # (8, TM), identical rows
    s1 = jnp.dot(mask, acc, preferred_element_type=jnp.float32)        # (8, C2p)
    s2 = jnp.dot(mask, acc * acc, preferred_element_type=jnp.float32)  # (8, C2p)
    stats_ref[0] = stats_ref[0] + jnp.concatenate([s1[0:1], s2[0:1]], axis=0)


def _bn_relu_kernel(y_ref, ss_ref, o_ref):
    """Pass 2: out = relu(y*scale + shift); drops the wrap columns on the fly.

    y_ref: (1, TOH, Wp, C2p) bf16;  ss_ref: (2, C2p) f32 [scale; shift];
    o_ref: (1, TOH, OW, C2p) f32 (lane-dense 128-wide stores).
    """
    ow = o_ref.shape[2]
    y = y_ref[0][:, :ow, :].astype(jnp.float32)
    o_ref[0] = jnp.maximum(y * ss_ref[0:1, :] + ss_ref[1:2, :], 0.0).astype(o_ref.dtype)


def conv_module_forward(x, w, gamma, beta, eps=EPS,
                        compute_dtype=jnp.bfloat16, slab_dtype=jnp.bfloat16):
    """Pallas-backed ConvModule forward. x: NCHW f32, w: (C2, C1, k, k) f32 -> NCHW f32."""
    N, C1, H, W = x.shape
    C2, C1w, k, k2 = w.shape
    assert C1w == C1 and k == k2, "weight/input channel or kernel mismatch"
    OH, OW = H - k + 1, W - k + 1
    assert OH >= 1 and OW >= 1
    Wp = ((W + SUBLANE - 1) // SUBLANE) * SUBLANE     # sublane-aligned row stride
    C2p = ((C2 + LANE - 1) // LANE) * LANE
    C1k = k * C1
    HWp = H * Wp

    # Layout plumbing (XLA side): NCHW -> channels-last rows with padded row stride Wp and
    # the kw taps folded into the lane dim.  (If the surrounding model already runs NHWC,
    # the boundary transposes here and at the end can be dropped.)
    xh = jnp.transpose(x, (0, 2, 3, 1))
    xh = jnp.pad(xh, ((0, 0), (0, 0), (0, Wp - W), (0, 0)))
    xflat = jnp.pad(xh.reshape(N, HWp, C1), ((0, 0), (0, k - 1), (0, 0)))
    xf = jnp.concatenate([xflat[:, kw:kw + HWp, :] for kw in range(k)], axis=-1)
    xf = xf.astype(compute_dtype)                                # (N, H*Wp, k*C1)

    # (C2, C1, kh, kw) -> (kh, kw*C1, C2p): lane order matches the folded input.
    wt = jnp.transpose(w, (2, 3, 1, 0)).reshape(k, C1k, C2)
    wt = jnp.pad(wt, ((0, 0), (0, 0), (0, C2p - C2))).astype(compute_dtype)

    vmem_limit = _vmem_limit_bytes()

    # ---- Pass 1: conv slab (bf16) + per-image BN partial sums --------------------------
    TOH = _pick_oh_tile(OH, Wp, C2p, row_cap=1024, acc_bytes_cap=128 * 1024)
    TM = TOH * Wp

    isz = jnp.dtype(compute_dtype).itemsize
    ssz = jnp.dtype(slab_dtype).itemsize
    cost1 = pl.CostEstimate(
        flops=int(2 * N * OH * Wp * C2p * (k * C1k + 2 * SUBLANE)),
        transcendentals=0,
        bytes_accessed=int(N * HWp * C1k * isz + k * C1k * C2p * isz
                           + N * OH * Wp * C2p * ssz + N * 2 * C2p * 4),
    )

    y_slab, stats = pl.pallas_call(
        functools.partial(_conv_stats_kernel, k=k, Wp=Wp, OW=OW, TOH=TOH),
        out_shape=(jax.ShapeDtypeStruct((N, OH, Wp, C2p), slab_dtype),
                   jax.ShapeDtypeStruct((N, 2, C2p), jnp.float32)),
        grid=(N, OH // TOH),
        in_specs=[
            pl.BlockSpec((1, HWp, C1k), lambda n, m: (n, 0, 0)),     # image resident over m
            pl.BlockSpec((k, C1k, C2p), lambda n, m: (0, 0, 0)),     # weights resident
        ],
        out_specs=(
            pl.BlockSpec((1, TOH, Wp, C2p), lambda n, m: (n, m, 0, 0)),
            pl.BlockSpec((1, 2, C2p), lambda n, m: (n, 0, 0)),       # per-image stats
        ),
        compiler_params=pltpu.CompilerParams(
            dimension_semantics=("parallel", "arbitrary"),           # per-image stats -> no race
            vmem_limit_bytes=vmem_limit),
        cost_estimate=cost1,
    )(xf, wt)

    # ---- Tiny XLA combine: global batch stats -> per-channel (scale, shift) ------------
    m_count = float(N * OH * OW)
    sums = jnp.sum(stats, axis=0)                                    # (2, C2p)
    mean = sums[0] / m_count
    # TODO(synk): one-pass moments in f32 can lose precision when |mean| >> std over very
    # large N*OH*OW; a mean-shifted / Welford-style combine would be more robust.
    var = jnp.maximum(sums[1] / m_count - mean * mean, 0.0)          # biased batch variance
    inv = jax.lax.rsqrt(var + eps)
    gamma_p = jnp.pad(gamma.astype(jnp.float32), (0, C2p - C2), constant_values=1.0)
    beta_p = jnp.pad(beta.astype(jnp.float32), (0, C2p - C2))
    scale = gamma_p * inv
    shift = beta_p - mean * scale
    ss = jnp.stack([scale, shift], axis=0)                           # (2, C2p)

    # ---- Pass 2: FMA + ReLU, wrap columns dropped in-kernel, fully parallel ------------
    TOH2 = _pick_oh_tile(OH, Wp, C2p, row_cap=2048, acc_bytes_cap=vmem_limit // 8)
    out4 = pl.pallas_call(
        _bn_relu_kernel,
        out_shape=jax.ShapeDtypeStruct((N, OH, OW, C2p), jnp.float32),
        grid=(N, OH // TOH2),
        in_specs=[
            pl.BlockSpec((1, TOH2, Wp, C2p), lambda n, m: (n, m, 0, 0)),
            pl.BlockSpec((2, C2p), lambda n, m: (0, 0)),
        ],
        out_specs=pl.BlockSpec((1, TOH2, OW, C2p), lambda n, m: (n, m, 0, 0)),
        compiler_params=pltpu.CompilerParams(
            dimension_semantics=("parallel", "parallel"),            # megacore on v7x
            vmem_limit_bytes=vmem_limit),
    )(y_slab, ss)

    # NCHW epilogue (channel un-pad + transpose) to match the module's contract.
    return jnp.transpose(out4[..., :C2], (0, 3, 1, 2))


def conv_module_reference(x, w, gamma, beta, eps=EPS):
    """Pure-JAX reference (f32) for numerical checking."""
    y = jax.lax.conv_general_dilated(
        x.astype(jnp.float32), w.astype(jnp.float32),
        window_strides=(1, 1), padding="VALID",
        dimension_numbers=("NCHW", "OIHW", "NCHW"),
        preferred_element_type=jnp.float32)
    mean = y.mean(axis=(0, 2, 3), keepdims=True)
    var = ((y - mean) ** 2).mean(axis=(0, 2, 3), keepdims=True)
    yn = (y - mean) * jax.lax.rsqrt(var + eps)
    yn = yn * gamma.reshape(1, -1, 1, 1) + beta.reshape(1, -1, 1, 1)
    return jnp.maximum(yn, 0.0)


if __name__ == "__main__":
    # Deterministic synthetic setup mirroring ConvModule(c1=4, c2=8, k=3).
    c1, c2, k = 4, 8, 3
    N, H, W = 2, 16, 16
    key = jax.random.PRNGKey(0)
    kx, kw_ = jax.random.split(key)

    x = jax.random.normal(kx, (N, c1, H, W), dtype=jnp.float32)
    bound = 1.0 / (c1 * k * k) ** 0.5          # PyTorch kaiming-uniform style bound
    w = jax.random.uniform(kw_, (c2, c1, k, k), jnp.float32, -bound, bound)
    gamma = jnp.ones((c2,), dtype=jnp.float32)  # BatchNorm2d default init
    beta = jnp.zeros((c2,), dtype=jnp.float32)  # BatchNorm2d default init
    # TODO(synk): running_mean/running_var updates (stateful training bookkeeping) are not
    # modelled; they do not affect the training-mode forward output.

    fwd = jax.jit(conv_module_forward)
    out = jax.block_until_ready(fwd(x, w, gamma, beta))
    assert out.shape == (N, c2, H - k + 1, W - k + 1), out.shape

    # Apples-to-apples check: reference with the same bf16 operand rounding (f32 accumulate);
    # tolerance covers the bf16 intermediate slab used between the two passes.
    x_bf = x.astype(jnp.bfloat16).astype(jnp.float32)
    w_bf = w.astype(jnp.bfloat16).astype(jnp.float32)
    ref_bf16 = conv_module_reference(x_bf, w_bf, gamma, beta)
    err = float(jnp.max(jnp.abs(out - ref_bf16)))
    assert jnp.allclose(out, ref_bf16, atol=4e-2, rtol=4e-2), err

    # Loose check against the full-f32 reference (bf16 MXU inputs + bf16 slab error budget).
    ref_f32 = conv_module_reference(x, w, gamma, beta)
    err32 = float(jnp.max(jnp.abs(out - ref_f32)))
    assert jnp.allclose(out, ref_f32, atol=7e-2, rtol=7e-2), err32

    print("KERNEL_OK")
</pallas_src>

<mosaic_0001>
module attributes {stable_mosaic.version = 11 : i64} {
  func.func @_conv_stats_kernel(%arg0: i32, %arg1: i32, %arg2: memref<1x256x12xbf16, #tpu.memory_space<vmem>>, %arg3: memref<3x12x128xbf16, #tpu.memory_space<vmem>>, %arg4: memref<1x14x16x128xbf16, #tpu.memory_space<vmem>>, %arg5: memref<1x2x128xf32, #tpu.memory_space<vmem>>) attributes {dimension_semantics = [#tpu.dimension_semantics<parallel>, #tpu.dimension_semantics<arbitrary>], iteration_bounds = array<i64: 2, 1>, scalar_prefetch = 0 : i64, scratch_operands = 0 : i64, tpu.core_type = #tpu.core_type<tc>, window_params = [{transform_indices = @transform_0, window_bounds = array<i64: 1, 256, 12>}, {pipeline_mode = #tpu.pipeline_mode<synchronous>, transform_indices = @transform_1, window_bounds = array<i64: 3, 12, 128>}, {transform_indices = @transform_2, window_bounds = array<i64: 1, 14, 16, 128>}, {transform_indices = @transform_3, window_bounds = array<i64: 1, 2, 128>}]} {
    %c0_i32 = arith.constant 0 : i32
    %0 = arith.cmpi eq, %arg1, %c0_i32 : i32
    %1 = arith.extui %0 : i1 to i32
    %c0_i32_0 = arith.constant 0 : i32
    %2 = arith.cmpi ne, %1, %c0_i32_0 : i32
    scf.if %2 {
      %cst_34 = arith.constant 0.000000e+00 : f32
      %70 = vector.broadcast %cst_34 : f32 to vector<1x2x128xf32>
      %c0_35 = arith.constant 0 : index
      %c0_36 = arith.constant 0 : index
      %c0_37 = arith.constant 0 : index
      %71 = vector.load %arg5[%c0_35, %c0_36, %c0_37] : memref<1x2x128xf32, #tpu.memory_space<vmem>>, vector<1x2x128xf32>
      tpu.vector_store %arg5[%c0_35, %c0_36, %c0_37], %70 {strides = array<i32>} : memref<1x2x128xf32, #tpu.memory_space<vmem>>, vector<1x2x128xf32>,
    } else {
    }
    %c224_i32 = arith.constant 224 : i32
    %3 = arith.muli %arg1, %c224_i32 : i32
    %cst = arith.constant 0.000000e+00 : f32
    %4 = vector.broadcast %cst : f32 to vector<224x128xf32>
    %c0_i32_1 = arith.constant 0 : i32
    %5 = arith.addi %3, %c0_i32_1 : i32
    %6 = tpu.assume_multiple %5, 8 : i32
    %c0 = arith.constant 0 : index
    %7 = arith.index_cast %6 : i32 to index
    %c0_2 = arith.constant 0 : index
    %8 = vector.load %arg2[%c0, %7, %c0_2] : memref<1x256x12xbf16, #tpu.memory_space<vmem>>, vector<1x224x12xbf16>
    %9 = vector.shape_cast %8 : vector<1x224x12xbf16> to vector<224x12xbf16>
    %c0_3 = arith.constant 0 : index
    %c0_4 = arith.constant 0 : index
    %c0_5 = arith.constant 0 : index
    %10 = vector.load %arg3[%c0_3, %c0_4, %c0_5] : memref<3x12x128xbf16, #tpu.memory_space<vmem>>, vector<1x12x128xbf16>
    %11 = vector.shape_cast %10 : vector<1x12x128xbf16> to vector<12x128xbf16>
    %cst_6 = arith.constant dense<0.000000e+00> : vector<224x128xf32>
    %12 = tpu.matmul %9, %11, %cst_6 {dimension_numbers = #tpu.dot_dimension_numbers<[1], [0], [0], [1], [0, 0, 1, 1], [], []>} : vector<224x12xbf16>, vector<12x128xbf16>, vector<224x128xf32> -> vector<224x128xf32>
    %13 = arith.addf %4, %12 : vector<224x128xf32>
    %c16_i32 = arith.constant 16 : i32
    %14 = arith.addi %3, %c16_i32 : i32
    %15 = tpu.assume_multiple %14, 8 : i32
    %c0_7 = arith.constant 0 : index
    %16 = arith.index_cast %15 : i32 to index
    %c0_8 = arith.constant 0 : index
    %17 = vector.load %arg2[%c0_7, %16, %c0_8] : memref<1x256x12xbf16, #tpu.memory_space<vmem>>, vector<1x224x12xbf16>
    %18 = vector.shape_cast %17 : vector<1x224x12xbf16> to vector<224x12xbf16>
    %c1 = arith.constant 1 : index
    %c0_9 = arith.constant 0 : index
    %c0_10 = arith.constant 0 : index
    %19 = vector.load %arg3[%c1, %c0_9, %c0_10] : memref<3x12x128xbf16, #tpu.memory_space<vmem>>, vector<1x12x128xbf16>
    %20 = vector.shape_cast %19 : vector<1x12x128xbf16> to vector<12x128xbf16>
    %cst_11 = arith.constant dense<0.000000e+00> : vector<224x128xf32>
    %21 = tpu.matmul %18, %20, %cst_11 {dimension_numbers = #tpu.dot_dimension_numbers<[1], [0], [0], [1], [0, 0, 1, 1], [], []>} : vector<224x12xbf16>, vector<12x128xbf16>, vector<224x128xf32> -> vector<224x128xf32>
    %22 = arith.addf %13, %21 : vector<224x128xf32>
    %c32_i32 = arith.constant 32 : i32
    %23 = arith.addi %3, %c32_i32 : i32
    %24 = tpu.assume_multiple %23, 8 : i32
    %c0_12 = arith.constant 0 : index
    %25 = arith.index_cast %24 : i32 to index
    %c0_13 = arith.constant 0 : index
    %26 = vector.load %arg2[%c0_12, %25, %c0_13] : memref<1x256x12xbf16, #tpu.memory_space<vmem>>, vector<1x224x12xbf16>
    %27 = vector.shape_cast %26 : vector<1x224x12xbf16> to vector<224x12xbf16>
    %c2 = arith.constant 2 : index
    %c0_14 = arith.constant 0 : index
    %c0_15 = arith.constant 0 : index
    %28 = vector.load %arg3[%c2, %c0_14, %c0_15] : memref<3x12x128xbf16, #tpu.memory_space<vmem>>, vector<1x12x128xbf16>
    %29 = vector.shape_cast %28 : vector<1x12x128xbf16> to vector<12x128xbf16>
    %cst_16 = arith.constant dense<0.000000e+00> : vector<224x128xf32>
    %30 = tpu.matmul %27, %29, %cst_16 {dimension_numbers = #tpu.dot_dimension_numbers<[1], [0], [0], [1], [0, 0, 1, 1], [], []>} : vector<224x12xbf16>, vector<12x128xbf16>, vector<224x128xf32> -> vector<224x128xf32>
    %31 = arith.addf %22, %30 : vector<224x128xf32>
    %32 = vector.shape_cast %31 : vector<224x128xf32> to vector<14x16x128xf32>
    %33 = arith.truncf %32 : vector<14x16x128xf32> to vector<14x16x128xbf16>
    %c0_17 = arith.constant 0 : index
    %c0_18 = arith.constant 0 : index
    %c0_19 = arith.constant 0 : index
    %c0_20 = arith.constant 0 : index
    %34 = vector.load %arg4[%c0_17, %c0_18, %c0_19, %c0_20] : memref<1x14x16x128xbf16, #tpu.memory_space<vmem>>, vector<1x14x16x128xbf16>
    %35 = vector.shape_cast %34 : vector<1x14x16x128xbf16> to vector<14x16x128xbf16>
    %36 = vector.shape_cast %33 : vector<14x16x128xbf16> to vector<1x14x16x128xbf16>
    tpu.vector_store %arg4[%c0_17, %c0_18, %c0_19, %c0_20], %36 {strides = array<i32>} : memref<1x14x16x128xbf16, #tpu.memory_space<vmem>>, vector<1x14x16x128xbf16>,
    %37 = tpu.iota {dimensions = array<i32: 1>} : vector<8x224xi32>
    %c16_i32_21 = arith.constant 16 : i32
    %c0_i32_22 = arith.constant 0 : i32
    %38 = arith.cmpi eq, %c16_i32_21, %c0_i32_22 : i32
    %c1_i32 = arith.constant 1 : i32
    %39 = arith.select %38, %c1_i32, %c16_i32_21 : i32
    %40 = vector.broadcast %39 : i32 to vector<8x224xi32>
    %41 = arith.remsi %37, %40 : vector<8x224xi32>
    %c0_i32_23 = arith.constant 0 : i32
    %42 = vector.broadcast %c0_i32_23 : i32 to vector<8x224xi32>
    %43 = arith.cmpi ne, %41, %42 : vector<8x224xi32>
    %c0_i32_24 = arith.constant 0 : i32
    %44 = vector.broadcast %c0_i32_24 : i32 to vector<8x224xi32>
    %45 = arith.cmpi slt, %41, %44 : vector<8x224xi32>
    %c0_i32_25 = arith.constant 0 : i32
    %46 = arith.cmpi slt, %39, %c0_i32_25 : i32
    %47 = vector.broadcast %46 : i1 to vector<8x224xi1>
    %48 = vector.broadcast %47 : vector<8x224xi1> to vector<8x224xi1>
    %49 = arith.xori %45, %48 : vector<8x224xi1>
    %50 = arith.andi %49, %43 : vector<8x224xi1>
    %51 = vector.broadcast %39 : i32 to vector<8x224xi32>
    %52 = arith.addi %41, %51 : vector<8x224xi32>
    %53 = arith.select %50, %52, %41 : vector<8x224xi1>, vector<8x224xi32>
    %c14_i32 = arith.constant 14 : i32
    %54 = vector.broadcast %c14_i32 : i32 to vector<8x224xi32>
    %55 = arith.cmpi slt, %53, %54 : vector<8x224xi32>
    %56 = arith.extui %55 : vector<8x224xi1> to vector<8x224xi32>
    %57 = arith.sitofp %56 : vector<8x224xi32> to vector<8x224xf32>
    %cst_26 = arith.constant dense<0.000000e+00> : vector<8x128xf32>
    %58 = tpu.matmul %57, %31, %cst_26 {dimension_numbers = #tpu.dot_dimension_numbers<[1], [0], [0], [1], [0, 0, 1, 1], [], []>} : vector<8x224xf32>, vector<224x128xf32>, vector<8x128xf32> -> vector<8x128xf32>
    %59 = arith.mulf %31, %31 : vector<224x128xf32>
    %cst_27 = arith.constant dense<0.000000e+00> : vector<8x128xf32>
    %60 = tpu.matmul %57, %59, %cst_27 {dimension_numbers = #tpu.dot_dimension_numbers<[1], [0], [0], [1], [0, 0, 1, 1], [], []>} : vector<8x224xf32>, vector<224x128xf32>, vector<8x128xf32> -> vector<8x128xf32>
    %c0_28 = arith.constant 0 : index
    %c0_29 = arith.constant 0 : index
    %c0_30 = arith.constant 0 : index
    %61 = vector.load %arg5[%c0_28, %c0_29, %c0_30] : memref<1x2x128xf32, #tpu.memory_space<vmem>>, vector<1x2x128xf32>
    %62 = vector.shape_cast %61 : vector<1x2x128xf32> to vector<2x128xf32>
    %63 = vector.extract_strided_slice %58 {offsets = [0, 0], sizes = [1, 128], strides = [1, 1]} : vector<8x128xf32> to vector<1x128xf32>
    %64 = vector.extract_strided_slice %60 {offsets = [0, 0], sizes = [1, 128], strides = [1, 1]} : vector<8x128xf32> to vector<1x128xf32>
    %65 = tpu.concatenate %63, %64 in 0 : vector<1x128xf32>, vector<1x128xf32> -> vector<2x128xf32>
    %66 = arith.addf %62, %65 : vector<2x128xf32>
    %c0_31 = arith.constant 0 : index
    %c0_32 = arith.constant 0 : index
    %c0_33 = arith.constant 0 : index
    %67 = vector.load %arg5[%c0_31, %c0_32, %c0_33] : memref<1x2x128xf32, #tpu.memory_space<vmem>>, vector<1x2x128xf32>
    %68 = vector.shape_cast %67 : vector<1x2x128xf32> to vector<2x128xf32>
    %69 = vector.shape_cast %66 : vector<2x128xf32> to vector<1x2x128xf32>
    tpu.vector_store %arg5[%c0_31, %c0_32, %c0_33], %69 {strides = array<i32>} : memref<1x2x128xf32, #tpu.memory_space<vmem>>, vector<1x2x128xf32>,
    return
  }
  func.func @transform_0(%arg0: i32, %arg1: i32) -> (i32, i32, i32) {
    %c0_i32 = arith.constant 0 : i32
    %c0_i32_0 = arith.constant 0 : i32
    %c0_i32_1 = arith.constant 0 : i32
    return %arg0, %c0_i32, %c0_i32_0 : i32, i32, i32
  }
  func.func @transform_1(%arg0: i32, %arg1: i32) -> (i32, i32, i32) {
    %c0_i32 = arith.constant 0 : i32
    %c0_i32_0 = arith.constant 0 : i32
    %c0_i32_1 = arith.constant 0 : i32
    %c0_i32_2 = arith.constant 0 : i32
    return %c0_i32, %c0_i32_0, %c0_i32_1 : i32, i32, i32
  }
  func.func @transform_2(%arg0: i32, %arg1: i32) -> (i32, i32, i32, i32) {
    %c0_i32 = arith.constant 0 : i32
    %c0_i32_0 = arith.constant 0 : i32
    %c0_i32_1 = arith.constant 0 : i32
    return %arg0, %arg1, %c0_i32, %c0_i32_0 : i32, i32, i32, i32
  }
  func.func @transform_3(%arg0: i32, %arg1: i32) -> (i32, i32, i32) {
    %c0_i32 = arith.constant 0 : i32
    %c0_i32_0 = arith.constant 0 : i32
    %c0_i32_1 = arith.constant 0 : i32
    return %arg0, %c0_i32, %c0_i32_0 : i32, i32, i32
  }
}

module attributes {stable_mosaic.version = 11 : i64} {
  func.func @_bn_relu_kernel(%arg0: i32, %arg1: i32, %arg2: memref<1x14x16x128xbf16, #tpu.memory_space<vmem>>, %arg3: memref<2x128xf32, #tpu.memory_space<vmem>>, %arg4: memref<1x14x14x128xf32, #tpu.memory_space<vmem>>) attributes {dimension_semantics = [#tpu.dimension_semantics<parallel>, #tpu.dimension_semantics<parallel>], iteration_bounds = array<i64: 2, 1>, scalar_prefetch = 0 : i64, scratch_operands = 0 : i64, tpu.core_type = #tpu.core_type<tc>, window_params = [{transform_indices = @transform_0, window_bounds = array<i64: 1, 14, 16, 128>}, {pipeline_mode = #tpu.pipeline_mode<synchronous>, transform_indices = @transform_1, window_bounds = array<i64: 2, 128>}, {transform_indices = @transform_2, window_bounds = array<i64: 1, 14, 14, 128>}]} {
    %c0 = arith.constant 0 : index
    %c0_0 = arith.constant 0 : index
    %c0_1 = arith.constant 0 : index
    %c0_2 = arith.constant 0 : index
    %0 = vector.load %arg2[%c0, %c0_0, %c0_1, %c0_2] : memref<1x14x16x128xbf16, #tpu.memory_space<vmem>>, vector<1x14x16x128xbf16>
    %1 = vector.shape_cast %0 : vector<1x14x16x128xbf16> to vector<14x16x128xbf16>
    %2 = vector.extract_strided_slice %1 {offsets = [0, 0, 0], sizes = [14, 14, 128], strides = [1, 1, 1]} : vector<14x16x128xbf16> to vector<14x14x128xbf16>
    %3 = arith.extf %2 : vector<14x14x128xbf16> to vector<14x14x128xf32>
    %c0_3 = arith.constant 0 : index
    %c0_4 = arith.constant 0 : index
    %4 = vector.load %arg3[%c0_3, %c0_4] : memref<2x128xf32, #tpu.memory_space<vmem>>, vector<1x128xf32>
    %5 = vector.shape_cast %4 : vector<1x128xf32> to vector<1x1x128xf32>
    %6 = vector.broadcast %5 : vector<1x1x128xf32> to vector<14x14x128xf32>
    %7 = arith.mulf %3, %6 : vector<14x14x128xf32>
    %c1 = arith.constant 1 : index
    %c0_5 = arith.constant 0 : index
    %8 = vector.load %arg3[%c1, %c0_5] : memref<2x128xf32, #tpu.memory_space<vmem>>, vector<1x128xf32>
    %9 = vector.shape_cast %8 : vector<1x128xf32> to vector<1x1x128xf32>
    %10 = vector.broadcast %9 : vector<1x1x128xf32> to vector<14x14x128xf32>
    %11 = arith.addf %7, %10 : vector<14x14x128xf32>
    %cst = arith.constant 0.000000e+00 : f32
    %12 = vector.broadcast %cst : f32 to vector<14x14x128xf32>
    %13 = arith.maximumf %11, %12 : vector<14x14x128xf32>
    %c0_6 = arith.constant 0 : index
    %c0_7 = arith.constant 0 : index
    %c0_8 = arith.constant 0 : index
    %c0_9 = arith.constant 0 : index
    %14 = vector.load %arg4[%c0_6, %c0_7, %c0_8, %c0_9] : memref<1x14x14x128xf32, #tpu.memory_space<vmem>>, vector<1x14x14x128xf32>
    %15 = vector.shape_cast %14 : vector<1x14x14x128xf32> to vector<14x14x128xf32>
    %16 = vector.shape_cast %13 : vector<14x14x128xf32> to vector<1x14x14x128xf32>
    tpu.vector_store %arg4[%c0_6, %c0_7, %c0_8, %c0_9], %16 {strides = array<i32>} : memref<1x14x14x128xf32, #tpu.memory_space<vmem>>, vector<1x14x14x128xf32>,
    return
  }
  func.func @transform_0(%arg0: i32, %arg1: i32) -> (i32, i32, i32, i32) {
    %c0_i32 = arith.constant 0 : i32
    %c0_i32_0 = arith.constant 0 : i32
    %c0_i32_1 = arith.constant 0 : i32
    return %arg0, %arg1, %c0_i32, %c0_i32_0 : i32, i32, i32, i32
  }
  func.func @transform_1(%arg0: i32, %arg1: i32) -> (i32, i32) {
    %c0_i32 = arith.constant 0 : i32
    %c0_i32_0 = arith.constant 0 : i32
    %c0_i32_1 = arith.constant 0 : i32
    return %c0_i32, %c0_i32_0 : i32, i32
  }
  func.func @transform_2(%arg0: i32, %arg1: i32) -> (i32, i32, i32, i32) {
    %c0_i32 = arith.constant 0 : i32
    %c0_i32_0 = arith.constant 0 : i32
    %c0_i32_1 = arith.constant 0 : i32
    return %arg0, %arg1, %c0_i32, %c0_i32_0 : i32, i32, i32, i32
  }
}

</mosaic_0001>

<bundles_post_ra>
// kernel: conv_module_forward.3
= control target key start
LH: loop header
LB: loop body
LE: loop exit
PB: predicated region body
PF: predicated region fallthrough
CT: control target
= control target key end

     0   :  { %s607_s9 = smov 0   ;;  %s609_s10 = smov 0   ;;  %s756_s0 = inlined_call_operand.vmem [shape: bf16[2,14,16,128], index: 0, kind: input, shape index: {}]   ;;  %s757_s1 = inlined_call_operand.vmem [shape: f32[2,128], index: 1, kind: input, shape index: {}]   ;;  %s758_s2 = inlined_call_operand.vmem [shape: f32[2,14,14,128], index: 2, kind: output, shape index: {}]  }
   0x1   :  { %s611_s11 = smov 0  }
   0x2 LB: > { %s24_s12 = sadd.s32 1, %s586_s10  ;;  %p466_p0 = scmp.ge.s32.totalorder %s590_s11, 1  ;;  %s590_s11 = sphi %s611_s11, %s12_s11   ;;  %s586_s10 = sphi %s609_s10, %s760_s10   ;;  %s582_s9 = sphi %s607_s9, %s759_s9  }
   0x3   : > { %p26_p1 = scmp.ge.s32.totalorder %s24_s12, 2  ;;  %p134_p2 = scmp.lt.s32.totalorder %s590_s11, 3 }
   0x5   : > { %s762_s12 = smov (%p26_p1, %s24_s12), 0  ;;  %p135_p3 = pnand %p466_p0, %p134_p2 }
   0x6   : > { %p167_p4 = scmp.lt.s32.totalorder (!%p135_p3), %s582_s9, 1 }
   0x7   : > { %138 = sbr.rel (%p135_p3) target bundleno = 50 (0x32), region = 28 }
   0xc   : > { %s764_s9 = smov (!%p167_p4, %s582_s9), 1  ;;  %v636_v0 = vld [vmem:[%s757_s1] ss:$0 sm:$0xff]  ;;  %v646_v9 = vld [vmem:[%s757_s1 + $0x1] ss:$0 sm:$0xff] }
   0xd   : > { %s542_s13 = smul.u32 112, %s764_s9 }
   0xe   : > { %s543_s19 = smul.u32 224, %s764_s9 }
   0xf   : > { %s631_s16 = scalar_lea.vmem %s756_s0, %s542_s13 }
  0x10   : > { %v474_v1 = vld [vmem:[%s631_s16] sm:$0xff]   ;;  %v529_v2 = vld [vmem:[%s631_s16 + $0x8] sm:$0xff]   ;;  %v530_v3 = vld [vmem:[%s631_s16 + $0x10] sm:$0xff]   ;;  %s663_s24 = scalar_lea.vmem %s758_s2, %s543_s19 }
  0x11   : > { %v475_v4 = vunpack.c.l.bf16 %v474_v1  ;;  %v476_v5 = vunpack.c.h.bf16 %v474_v1  ;;  %v479_v6 = vunpack.c.l.bf16 %v529_v2  ;;  %v480_v7 = vunpack.c.h.bf16 %v529_v2  ;;  %v531_v8 = vld [vmem:[%s631_s16 + $0x18] sm:$0xff]   ;;  %v532_v30 = vld [vmem:[%s631_s16 + $0x20] sm:$0xff]   ;;  %v533_v31 = vld [vmem:[%s631_s16 + $0x28] sm:$0xff]  }
  0x12   : > { %v483_v10 = vunpack.c.l.bf16 %v530_v3  ;;  %v484_v11 = vunpack.c.h.bf16 %v530_v3  ;;  %v487_v12 = vunpack.c.l.bf16 %v531_v8  ;;  %v488_v13 = vunpack.c.h.bf16 %v531_v8  ;;  %v534_v36 = vld [vmem:[%s631_s16 + $0x30] sm:$0xff]   ;;  %v535_v37 = vld [vmem:[%s631_s16 + $0x38] sm:$0xff]   ;;  %v536_v3 = vld [vmem:[%s631_s16 + $0x40] sm:$0xff]  }
  0x13   : > { %v249_v14 = vmul.f32 %v475_v4, %v636_v0  ;;  %v250_v15 = vmul.f32 %v476_v5, %v636_v0  ;;  %v251_v16 = vmul.f32 %v479_v6, %v636_v0  ;;  %v252_v17 = vmul.f32 %v480_v7, %v636_v0  ;;  %v537_v4 = vld [vmem:[%s631_s16 + $0x48] sm:$0xff]  }
  0x14   : > { %v253_v18 = vmul.f32 %v483_v10, %v636_v0  ;;  %v254_v19 = vmul.f32 %v484_v11, %v636_v0  ;;  %v255_v20 = vmul.f32 %v487_v12, %v636_v0  ;;  %v256_v21 = vmul.f32 %v488_v13, %v636_v0  ;;  %v538_v10 = vld [vmem:[%s631_s16 + $0x50] sm:$0xff]   ;;  %v539_v11 = vld [vmem:[%s631_s16 + $0x58] sm:$0xff]  }
  0x15   : > { %v282_v22 = vadd.f32 %v646_v9, %v249_v14  ;;  %v283_v23 = vadd.f32 %v646_v9, %v250_v15  ;;  %v284_v24 = vadd.f32 %v646_v9, %v251_v16  ;;  %v285_v25 = vadd.f32 %v646_v9, %v252_v17 }
  0x16   : > { %v286_v26 = vadd.f32 %v646_v9, %v253_v18  ;;  %v287_v27 = vadd.f32 %v646_v9, %v254_v19  ;;  %v288_v28 = vadd.f32 %v646_v9, %v255_v20  ;;  %v289_v29 = vadd.f32 %v646_v9, %v256_v21 }
  0x17   : > { %v310_v32 = vmax.f32 %v282_v22, 0.0  ;;  %v311_v33 = vmax.f32 %v283_v23, 0.0  ;;  %v312_v34 = vmax.f32 %v284_v24, 0.0  ;;  %v313_v35 = vmax.f32 %v285_v25, 0.0 }
  0x18   : > { %v314_v38 = vmax.f32 %v286_v26, 0.0  ;;  %v315_v39 = vmax.f32 %v287_v27, 0.0  ;;  %v316_v40 = vmax.f32 %v288_v28, 0.0  ;;  %v317_v41 = vmax.f32 %v289_v29, 0.0 }
  0x19   : > { %338 = vst [vmem:[%s663_s24] sm:$0xff] %v310_v32  ;;  %339 = vst [vmem:[%s663_s24 + $0x8] sm:$0x3f] %v311_v33  ;;  %v491_v42 = vunpack.c.l.bf16 %v532_v30  ;;  %v492_v43 = vunpack.c.h.bf16 %v532_v30  ;;  %v495_v44 = vunpack.c.l.bf16 %v533_v31  ;;  %v496_v45 = vunpack.c.h.bf16 %v533_v31 }
  0x1a   : > { %340 = vst [vmem:[%s663_s24 + $0x10] sm:$0xff] %v312_v34  ;;  %341 = vst [vmem:[%s663_s24 + $0x18] sm:$0x3f] %v313_v35  ;;  %v499_v46 = vunpack.c.l.bf16 %v534_v36  ;;  %v500_v47 = vunpack.c.h.bf16 %v534_v36  ;;  %v503_v48 = vunpack.c.l.bf16 %v535_v37  ;;  %v504_v49 = vunpack.c.h.bf16 %v535_v37 }
  0x1b   : > { %342 = vst [vmem:[%s663_s24 + $0x20] sm:$0xff] %v314_v38  ;;  %343 = vst [vmem:[%s663_s24 + $0x28] sm:$0x3f] %v315_v39  ;;  %v257_v50 = vmul.f32 %v491_v42, %v636_v0  ;;  %v258_v51 = vmul.f32 %v492_v43, %v636_v0  ;;  %v259_v52 = vmul.f32 %v495_v44, %v636_v0  ;;  %v507_v16 = vunpack.c.l.bf16 %v536_v3 }
  0x1c   : > { %344 = vst [vmem:[%s663_s24 + $0x30] sm:$0xff] %v316_v40  ;;  %345 = vst [vmem:[%s663_s24 + $0x38] sm:$0x3f] %v317_v41  ;;  %v260_v53 = vmul.f32 %v496_v45, %v636_v0  ;;  %v261_v54 = vmul.f32 %v499_v46, %v636_v0  ;;  %v262_v55 = vmul.f32 %v500_v47, %v636_v0  ;;  %v508_v17 = vunpack.c.h.bf16 %v536_v3  ;;  %v540_v40 = vld [vmem:[%s631_s16 + $0x60] sm:$0xff]   ;;  %v541_v41 = vld [vmem:[%s631_s16 + $0x68] sm:$0xff]  }
  0x1d   : > { %v263_v56 = vmul.f32 %v503_v48, %v636_v0  ;;  %v264_v57 = vmul.f32 %v504_v49, %v636_v0  ;;  %v290_v58 = vadd.f32 %v646_v9, %v257_v50  ;;  %v291_v59 = vadd.f32 %v646_v9, %v258_v51 }
  0x1e   : > { %v292_v60 = vadd.f32 %v646_v9, %v259_v52  ;;  %v293_v61 = vadd.f32 %v646_v9, %v260_v53  ;;  %v294_v62 = vadd.f32 %v646_v9, %v261_v54  ;;  %v295_v63 = vadd.f32 %v646_v9, %v262_v55 }
  0x1f   : > { %v296_v1 = vadd.f32 %v646_v9, %v263_v56  ;;  %v297_v2 = vadd.f32 %v646_v9, %v264_v57  ;;  %v318_v5 = vmax.f32 %v290_v58, 0.0  ;;  %v319_v6 = vmax.f32 %v291_v59, 0.0 }
  0x20   : > { %v320_v7 = vmax.f32 %v292_v60, 0.0  ;;  %v321_v8 = vmax.f32 %v293_v61, 0.0  ;;  %v322_v12 = vmax.f32 %v294_v62, 0.0  ;;  %v323_v13 = vmax.f32 %v295_v63, 0.0 }
  0x21   : > { %v324_v14 = vmax.f32 %v296_v1, 0.0  ;;  %v325_v15 = vmax.f32 %v297_v2, 0.0  ;;  %346 = vst [vmem:[%s663_s24 + $0x40] sm:$0xff] %v318_v5  ;;  %347 = vst [vmem:[%s663_s24 + $0x48] sm:$0x3f] %v319_v6  ;;  %v511_v18 = vunpack.c.l.bf16 %v537_v4  ;;  %v512_v19 = vunpack.c.h.bf16 %v537_v4 }
  0x22   : > { %348 = vst [vmem:[%s663_s24 + $0x50] sm:$0xff] %v320_v7  ;;  %349 = vst [vmem:[%s663_s24 + $0x58] sm:$0x3f] %v321_v8  ;;  %v515_v20 = vunpack.c.l.bf16 %v538_v10  ;;  %v516_v21 = vunpack.c.h.bf16 %v538_v10  ;;  %v519_v22 = vunpack.c.l.bf16 %v539_v11  ;;  %v520_v23 = vunpack.c.h.bf16 %v539_v11 }
  0x23   : > { %350 = vst [vmem:[%s663_s24 + $0x60] sm:$0xff] %v322_v12  ;;  %351 = vst [vmem:[%s663_s24 + $0x68] sm:$0x3f] %v323_v13  ;;  %v265_v24 = vmul.f32 %v507_v16, %v636_v0  ;;  %v266_v25 = vmul.f32 %v508_v17, %v636_v0  ;;  %v267_v26 = vmul.f32 %v511_v18, %v636_v0  ;;  %v523_v50 = vunpack.c.l.bf16 %v540_v40 }
  0x24   : > { %352 = vst [vmem:[%s663_s24 + $0x70] sm:$0xff] %v324_v14  ;;  %353 = vst [vmem:[%s663_s24 + $0x78] sm:$0x3f] %v325_v15  ;;  %v268_v27 = vmul.f32 %v512_v19, %v636_v0  ;;  %v269_v28 = vmul.f32 %v515_v20, %v636_v0  ;;  %v270_v29 = vmul.f32 %v516_v21, %v636_v0  ;;  %v524_v51 = vunpack.c.h.bf16 %v540_v40 }
  0x25   : > { %v271_v30 = vmul.f32 %v519_v22, %v636_v0  ;;  %v272_v31 = vmul.f32 %v520_v23, %v636_v0  ;;  %v298_v32 = vadd.f32 %v646_v9, %v265_v24  ;;  %v299_v33 = vadd.f32 %v646_v9, %v266_v25 }
  0x26   : > { %v300_v34 = vadd.f32 %v646_v9, %v267_v26  ;;  %v301_v35 = vadd.f32 %v646_v9, %v268_v27  ;;  %v302_v36 = vadd.f32 %v646_v9, %v269_v28  ;;  %v303_v37 = vadd.f32 %v646_v9, %v270_v29 }
  0x27   : > { %v304_v38 = vadd.f32 %v646_v9, %v271_v30  ;;  %v305_v39 = vadd.f32 %v646_v9, %v272_v31  ;;  %v326_v42 = vmax.f32 %v298_v32, 0.0  ;;  %v327_v43 = vmax.f32 %v299_v33, 0.0 }
  0x28   : > { %v328_v44 = vmax.f32 %v300_v34, 0.0  ;;  %v329_v45 = vmax.f32 %v301_v35, 0.0  ;;  %v330_v46 = vmax.f32 %v302_v36, 0.0  ;;  %v331_v47 = vmax.f32 %v303_v37, 0.0 }
  0x29   : > { %v332_v48 = vmax.f32 %v304_v38, 0.0  ;;  %v333_v49 = vmax.f32 %v305_v39, 0.0  ;;  %354 = vst [vmem:[%s663_s24 + $0x80] sm:$0xff] %v326_v42  ;;  %355 = vst [vmem:[%s663_s24 + $0x88] sm:$0x3f] %v327_v43  ;;  %v527_v52 = vunpack.c.l.bf16 %v541_v41  ;;  %v528_v53 = vunpack.c.h.bf16 %v541_v41 }
  0x2a   : > { %356 = vst [vmem:[%s663_s24 + $0x90] sm:$0xff] %v328_v44  ;;  %357 = vst [vmem:[%s663_s24 + $0x98] sm:$0x3f] %v329_v45  ;;  %v273_v54 = vmul.f32 %v523_v50, %v636_v0  ;;  %v274_v55 = vmul.f32 %v524_v51, %v636_v0 }
  0x2b   : > { %358 = vst [vmem:[%s663_s24 + $0xa0] sm:$0xff] %v330_v46  ;;  %359 = vst [vmem:[%s663_s24 + $0xa8] sm:$0x3f] %v331_v47  ;;  %v275_v56 = vmul.f32 %v527_v52, %v636_v0  ;;  %v276_v57 = vmul.f32 %v528_v53, %v636_v0 }
  0x2c   : > { %360 = vst [vmem:[%s663_s24 + $0xb0] sm:$0xff] %v332_v48  ;;  %361 = vst [vmem:[%s663_s24 + $0xb8] sm:$0x3f] %v333_v49  ;;  %v306_v58 = vadd.f32 %v646_v9, %v273_v54  ;;  %v307_v59 = vadd.f32 %v646_v9, %v274_v55 }
  0x2d   : > { %v308_v60 = vadd.f32 %v646_v9, %v275_v56  ;;  %v309_v61 = vadd.f32 %v646_v9, %v276_v57 }
  0x2e   : > { %v334_v62 = vmax.f32 %v306_v58, 0.0  ;;  %v335_v63 = vmax.f32 %v307_v59, 0.0 }
  0x2f   : > { %v336_v1 = vmax.f32 %v308_v60, 0.0  ;;  %v337_v2 = vmax.f32 %v309_v61, 0.0 }
  0x30   : > { %362 = vst [vmem:[%s663_s24 + $0xc0] sm:$0xff] %v334_v62  ;;  %363 = vst [vmem:[%s663_s24 + $0xc8] sm:$0x3f] %v335_v63 }
  0x31   : > { %364 = vst [vmem:[%s663_s24 + $0xd0] sm:$0xff] %v336_v1  ;;  %365 = vst [vmem:[%s663_s24 + $0xd8] sm:$0x3f] %v337_v2 }
  0x32 PF: > { %s12_s11 = sadd.s32 1, %s590_s11   ;;  %s759_s9 = smov %s586_s10 }
  0x33   : > { %p9_p5 = scmp.ge.s32.totalorder %s12_s11, 4   ;;  %s760_s10 = smov %s762_s12 }
  0x35   :  { %11 = sbr.rel (!%p9_p5) target bundleno = 2 (0x2), region = 58 }

// kernel: conv_module_forward.2
= control target key start
LH: loop header
LB: loop body
LE: loop exit
PB: predicated region body
PF: predicated region fallthrough
CT: control target
= control target key end

     0   :  { %s2185_s12 = smov 0   ;;  %s2187_s13 = smov 0   ;;  %s2577_s0 = inlined_call_operand.vmem [shape: bf16[2,256,12], index: 0, kind: input, shape index: {}]   ;;  %s2578_s1 = inlined_call_operand.vmem [shape: bf16[3,12,128], index: 1, kind: input, shape index: {}]   ;;  %s2579_s2 = inlined_call_operand.vmem [shape: bf16[2,14,16,128], index: 2, kind: output, shape index: {0}]   ;;  %s2580_s3 = inlined_call_operand.vmem [shape: f32[2,2,128], index: 3, kind: output, shape index: {1}]  }
   0x1   :  { %s2189_s14 = smov 0  }
   0x2 LB: > { %s26_s15 = sadd.s32 1, %s2157_s13  ;;  %p1626_p0 = scmp.ge.s32.totalorder %s2161_s14, 1  ;;  %s2161_s14 = sphi %s2189_s14, %s14_s14   ;;  %s2157_s13 = sphi %s2187_s13, %s2582_s13   ;;  %s2153_s12 = sphi %s2185_s12, %s2581_s12  }
   0x3   : > { %p28_p1 = scmp.ge.s32.totalorder %s26_s15, 2  ;;  %p154_p2 = scmp.lt.s32.totalorder %s2161_s14, 3 }
   0x5   : > { %s2584_s15 = smov (%p28_p1, %s26_s15), 0  ;;  %p155_p3 = pnand %p1626_p0, %p154_p2 }
   0x6   : > { %p187_p4 = scmp.lt.s32.totalorder (!%p155_p3), %s2153_s12, 1 }
   0x7   : > { %158 = sbr.rel (%p155_p3) target bundleno = 528 (0x210), region = 28 }
   0xc   : > { %v2094_v0 = vld [vmem:[%s2578_s1 + $0x8] sm:$0x3f]   ;;  %vm402_vm0 = vcmask 1045504   ;;  %v2099_v2 = vld [vmem:[%s2578_s1 + $0x10] sm:$0x3f]   ;;  %s2586_s12 = smov (!%p187_p4, %s2153_s12), 1  ;;  %v1285_v49 = vlaneseq }
   0xd   : > { %2063 = vmatprep.subr.msk.bf16.mxu0 %vm402_vm0, %v2094_v0  ;;  %2064 = vmatprep.subr.msk.bf16.mxu1 %vm402_vm0, %v2094_v0  ;;  %v404_v1 = vsel %vm402_vm0, %v2094_v0, 0  ;;  %v2100_v3 = vld [vmem:[%s2578_s1] sm:$0x3f]   ;;  %s1814_s22 = sshll.u32 %s2586_s12, 7  ;;  %vm359_vm1 = vcmask 97280   ;;  %v970_v7 = vsel %vm402_vm0, %v2099_v2, 0 }
   0xe   : > { %1972 = vmatpush3.bf16.msra.mxu0 %v404_v1  ;;  %2062 = vmatpush3.bf16.msra.mxu1 %v404_v1  ;;  %s2222_s25 = scalar_lea.vmem %s2577_s0, %s1814_s22  ;;  %v669_v9 = vsel %vm402_vm0, %v2100_v3, 0  ;;  %v2163_v48 = vmov 0.0   ;;  %v2313_v50 = vand.u32 127, %v1285_v49  ;;  %vm1318_vm3 = vcmask 785408   ;;  %s2067_s26 = smul.u32 112, %s2586_s12 }
   0xf   : > { %2066 = vmatprep.subr.msk.bf16.mxu0 %vm402_vm0, %v2099_v2  ;;  %2065 = vmatprep.subr.msk.bf16.mxu1 %vm402_vm0, %v2100_v3  ;;  %v2095_v4 = vld [vmem:[%s2222_s25 + $0x8] sm:$0xff]   ;;  %v2097_v6 = vld [vmem:[%s2222_s25 + $0x10] sm:$0xff]   ;;  %v2101_v10 = vld [vmem:[%s2222_s25 + $0x18] sm:$0xff]   ;;  %s1630_s30 = sshll.u32 %s2586_s12, 1  ;;  %vm1494_vm5 = vcmask 1040384  }
  0x10   : > { %v2096_v5 = vld [vmem:[%s2222_s25 + $0x48] sm:$0xff]   ;;  %1973 = vmatprep.mubr.msk.bf16.mxu0 %vm359_vm1, %v2095_v4  ;;  %v2098_v8 = vld [vmem:[%s2222_s25 + $0x50] sm:$0xff]   ;;  %v2102_v11 = vld [vmem:[%s2222_s25 + $0x58] sm:$0xff]   ;;  %v1287_v51 = vadd.s32 128, %v2313_v50  ;;  %s2359_s29 = scalar_lea.vmem %s2579_s2, %s2067_s26  ;;  %s206_s6 = scalar_lea.vmem %s2580_s3, %s1630_s30 }
  0x11   : > { %1989 = vmatprep.mubr.msk.bf16.mxu1 %vm359_vm1, %v2096_v5  ;;  %1974 = vmatmul.mubr.msk.bf16.vlgmr.msra.gmra.mxu0 %vm359_vm1, %v2097_v6  ;;  %v2103_v12 = vld [vmem:[%s2222_s25 + $0x20] sm:$0xff]   ;;  %v2105_v14 = vld [vmem:[%s2222_s25 + $0x28] sm:$0xff]   ;;  %v2107_v16 = vld [vmem:[%s2222_s25 + $0x30] sm:$0xff]   ;;  %212 = vst [vmem:[%s206_s6] sm:$0x3] %v2163_v48 }
  0x12   : > { %1990 = vmatmul.mubr.msk.bf16.vlgmr.msra.gmra.mxu1 %vm359_vm1, %v2098_v8  ;;  %2032 = vmatpush3.bf16.msra.mxu0 %v970_v7  ;;  %v2104_v13 = vld [vmem:[%s2222_s25 + $0x60] sm:$0xff]   ;;  %v2106_v15 = vld [vmem:[%s2222_s25 + $0x68] sm:$0xff]   ;;  %v2108_v17 = vld [vmem:[%s2222_s25 + $0x70] sm:$0xff]   ;;  %v1299_v52 = vand.u32 15, %v1287_v51 }
  0x13   : > { %1977 = vmatprep.mubr.msk.bf16.mxu0 %vm359_vm1, %v2101_v10  ;;  %2002 = vmatpush3.bf16.msra.mxu1 %v669_v9  ;;  %v2109_v18 = vld [vmem:[%s2222_s25 + $0x38] sm:$0xff]   ;;  %v2110_v19 = vld [vmem:[%s2222_s25] sm:$0xff]   ;;  %v2112_v21 = vld [vmem:[%s2222_s25 + $0x8] sm:$0xff]  }
  0x14   : > { %1993 = vmatprep.mubr.msk.bf16.mxu1 %vm359_vm1, %v2102_v11  ;;  %v2111_v20 = vld [vmem:[%s2222_s25 + $0x40] sm:$0xff]   ;;  %v2114_v22 = vld [vmem:[%s2222_s25 + $0x10] sm:$0xff]   ;;  %v2115_v24 = vld [vmem:[%s2222_s25 + $0x18] sm:$0xff]   ;;  %1322 = vmatprep.subr.mxu1 %v2163_v48  ;;  %vm1313_vm2 = vcmp.lt.s32.totalorder %v1299_v52, 14 }
  0x15   : > { %v2113_v23 = vld [vmem:[%s2222_s25 + $0x10] sm:$0xff]   ;;  %v2116_v25 = vld [vmem:[%s2222_s25 + $0x18] sm:$0xff]   ;;  %v2118_v26 = vld [vmem:[%s2222_s25 + $0x20] sm:$0xff]   ;;  %1420 = vmatprep.subr.mxu0 %v2163_v48  ;;  %v1807_v53 = vsel %vm1313_vm2, 1.0, %v2163_v48 }
  0x16   : > { %v2117_v27 = vld [vmem:[%s2222_s25 + $0x20] sm:$0xff]   ;;  %v2119_v28 = vld [vmem:[%s2222_s25 + $0x28] sm:$0xff]   ;;  %v2122_v30 = vld [vmem:[%s2222_s25 + $0x30] sm:$0xff]  }
  0x17   : > { %v2120_v29 = vld [vmem:[%s2222_s25 + $0x28] sm:$0xff]   ;;  %v2121_v31 = vld [vmem:[%s2222_s25 + $0x30] sm:$0xff]   ;;  %v2124_v32 = vld [vmem:[%s2222_s25 + $0x38] sm:$0xff]  }
  0x18   : > { %v2123_v33 = vld [vmem:[%s2222_s25 + $0x38] sm:$0xff]   ;;  %v2126_v34 = vld [vmem:[%s2222_s25 + $0x40] sm:$0xff]   ;;  %v2128_v36 = vld [vmem:[%s2222_s25 + $0x48] sm:$0xff]  }
  0x19   : > { %1978 = vmatmul.mubr.msk.bf16.gmra.mxu0 %vm359_vm1, %v2103_v12  ;;  %v2125_v35 = vld [vmem:[%s2222_s25 + $0x40] sm:$0xff]   ;;  %v2127_v37 = vld [vmem:[%s2222_s25 + $0x48] sm:$0xff]   ;;  %v2130_v38 = vld [vmem:[%s2222_s25 + $0x50] sm:$0xff]  }
  0x1a   : > { %1994 = vmatmul.mubr.msk.bf16.gmra.mxu1 %vm359_vm1, %v2104_v13  ;;  %1981 = vmatprep.mubr.msk.bf16.mxu0 %vm359_vm1, %v2105_v14  ;;  %v2129_v39 = vld [vmem:[%s2222_s25 + $0x50] sm:$0xff]   ;;  %v2132_v40 = vld [vmem:[%s2222_s25 + $0x58] sm:$0xff]   ;;  %v2134_v42 = vld [vmem:[%s2222_s25 + $0x60] sm:$0xff]  }
  0x1b   : > { %1997 = vmatprep.mubr.msk.bf16.mxu1 %vm359_vm1, %v2106_v15  ;;  %v2131_v41 = vld [vmem:[%s2222_s25 + $0x58] sm:$0xff]   ;;  %v2133_v43 = vld [vmem:[%s2222_s25 + $0x60] sm:$0xff]   ;;  %v2136_v44 = vld [vmem:[%s2222_s25 + $0x68] sm:$0xff]  }
  0x1c   : > { %v2135_v45 = vld [vmem:[%s2222_s25 + $0x68] sm:$0xff]   ;;  %v2137_v46 = vld [vmem:[%s2222_s25 + $0x70] sm:$0xff]   ;;  %v2138_v47 = vld [vmem:[%s2222_s25 + $0x78] sm:$0xff]  }
  0x21   : > { %1982 = vmatmul.mubr.msk.bf16.gmra.mxu0 %vm359_vm1, %v2107_v16 }
  0x22   : > { %1998 = vmatmul.mubr.msk.bf16.gmra.mxu1 %vm359_vm1, %v2108_v17  ;;  %1985 = vmatprep.mubr.msk.bf16.mxu0 %vm359_vm1, %v2109_v18 }
  0x23   : > { %2003 = vmatprep.mubr.msk.bf16.mxu1 %vm359_vm1, %v2110_v19 }
  0x29   : > { %1986 = vmatmul.mubr.msk.bf16.gmra.mxu0 %vm359_vm1, %v2111_v20 }
  0x2a   : > { %2004 = vmatmul.mubr.msk.bf16.vlgmr.msra.gmra.mxu1 %vm359_vm1, %v2112_v21  ;;  %2033 = vmatprep.mubr.msk.bf16.mxu0 %vm359_vm1, %v2114_v22 }
  0x2b   : > { %2007 = vmatprep.mubr.msk.bf16.mxu1 %vm359_vm1, %v2113_v23 }
  0x31   : > { %2034 = vmatmul.mubr.msk.bf16.vlgmr.msra.gmra.mxu0 %vm359_vm1, %v2116_v25 }
  0x32   : > { %2008 = vmatmul.mubr.msk.bf16.gmra.mxu1 %vm359_vm1, %v2115_v24  ;;  %2037 = vmatprep.mubr.msk.bf16.mxu0 %vm359_vm1, %v2118_v26 }
  0x33   : > { %2011 = vmatprep.mubr.msk.bf16.mxu1 %vm359_vm1, %v2117_v27 }
  0x39   : > { %2038 = vmatmul.mubr.msk.bf16.gmra.mxu0 %vm359_vm1, %v2120_v29 }
  0x3a   : > { %2012 = vmatmul.mubr.msk.bf16.gmra.mxu1 %vm359_vm1, %v2119_v28  ;;  %2041 = vmatprep.mubr.msk.bf16.mxu0 %vm359_vm1, %v2122_v30 }
  0x3b   : > { %2015 = vmatprep.mubr.msk.bf16.mxu1 %vm359_vm1, %v2121_v31 }
  0x41   : > { %2042 = vmatmul.mubr.msk.bf16.gmra.mxu0 %vm359_vm1, %v2124_v32 }
  0x42   : > { %2016 = vmatmul.mubr.msk.bf16.gmra.mxu1 %vm359_vm1, %v2123_v33  ;;  %2045 = vmatprep.mubr.msk.bf16.mxu0 %vm359_vm1, %v2126_v34 }
  0x43   : > { %2019 = vmatprep.mubr.msk.bf16.mxu1 %vm359_vm1, %v2125_v35 }
  0x49   : > { %2046 = vmatmul.mubr.msk.bf16.gmra.mxu0 %vm359_vm1, %v2128_v36 }
  0x4a   : > { %2020 = vmatmul.mubr.msk.bf16.gmra.mxu1 %vm359_vm1, %v2127_v37  ;;  %2049 = vmatprep.mubr.msk.bf16.mxu0 %vm359_vm1, %v2130_v38 }
  0x4b   : > { %2023 = vmatprep.mubr.msk.bf16.mxu1 %vm359_vm1, %v2129_v39 }
  0x51   : > { %2050 = vmatmul.mubr.msk.bf16.gmra.mxu0 %vm359_vm1, %v2132_v40 }
  0x52   : > { %2024 = vmatmul.mubr.msk.bf16.gmra.mxu1 %vm359_vm1, %v2131_v41  ;;  %2053 = vmatprep.mubr.msk.bf16.mxu0 %vm359_vm1, %v2134_v42 }
  0x53   : > { %2027 = vmatprep.mubr.msk.bf16.mxu1 %vm359_vm1, %v2133_v43 }
  0x59   : > { %2054 = vmatmul.mubr.msk.bf16.gmra.mxu0 %vm359_vm1, %v2136_v44 }
  0x5a   : > { %2028 = vmatmul.mubr.msk.bf16.gmra.mxu1 %vm359_vm1, %v2135_v45  ;;  %2057 = vmatprep.mubr.msk.bf16.mxu0 %vm359_vm1, %v2137_v46 }
  0x5b   : > { %1808 = vmatprep.mubr.msk.f32.mxu1 %vm1318_vm3, %v1807_v53 }
  0x61   : > { %2058 = vmatmul.mubr.msk.bf16.gmra.mxu0 %vm359_vm1, %v2138_v47 }
  0x62   : > { %1810 = vmatprep.mubr.msk.f32.mxu0 %vm1318_vm3, %v1807_v53 }
  0xd1   : > { %v1975_v54 = vpop.f32.mrf.mxu0 }
  0xd2   : > { %v2317_v55 = vpop.f32.mrf.mxu1 }
  0xd3   : > { %v440_v56 = vpop.f32.mrf.mxu0 }
  0xd4   : > { %v2319_v57 = vpop.f32.mrf.mxu1 }
  0xd5   : > { %v1976_v58 = vpop.f32.mrf.mxu0 }
  0xd6   : > { %v2321_v59 = vpop.f32.mrf.mxu1 }
  0xd7   : > { %v443_v60 = vpop.f32.mrf.mxu0 }
  0xd8   : > { %v2323_v61 = vpop.f32.mrf.mxu1 }
  0xd9   : > { %v1979_v62 = vpop.f32.mrf.mxu0 }
  0xda   : > { %v2325_v63 = vpop.f32.mrf.mxu1 }
  0xdb   : > { %v456_v0 = vpop.f32.mrf.mxu0 }
  0xdc   : > { %v2327_v1 = vpop.f32.mrf.mxu1 }
  0xdd   : > { %v1980_v2 = vpop.f32.mrf.mxu0 }
  0xde   : > { %v2329_v3 = vpop.f32.mrf.mxu1 }
  0xdf   : > { %v459_v4 = vpop.f32.mrf.mxu0 }
  0xe0   : > { %v2331_v5 = vpop.f32.mrf.mxu1 }
  0xe1   : > { %v1983_v6 = vpop.f32.mrf.mxu0 }
  0xe2   : > { %v2333_v7 = vpop.f32.mrf.mxu1 }
  0xe3   : > { %v2335_v8 = vpop.f32.mrf.mxu0 }
  0xe4   : > { %v2337_v9 = vpop.f32.mrf.mxu1 }
  0xe5   : > { %v1984_v10 = vpop.f32.mrf.mxu0 }
  0xe6   : > { %v2339_v11 = vpop.f32.mrf.mxu1 }
  0xe7   : > { %v475_v12 = vpop.f32.mrf.mxu0 }
  0xe8   : > { %v2341_v13 = vpop.f32.mrf.mxu1 }
  0xe9   : > { %v2343_v14 = vpop.f32.mrf.mxu0 }
  0xea   : > { %v2005_v15 = vpop.f32.mrf.mxu1 }
  0xeb   : > { %v2345_v16 = vpop.f32.mrf.mxu0  ;;  %v714_v25 = vadd.f32 %v2005_v15, %v1975_v54 }
  0xec   : > { %v705_v17 = vpop.f32.mrf.mxu1 }
  0xed   : > { %v2347_v18 = vpop.f32.mrf.mxu0  ;;  %v706_v29 = vadd.f32 %v705_v17, %v440_v56 }
  0xee   : > { %v2006_v19 = vpop.f32.mrf.mxu1 }
  0xef   : > { %v2349_v20 = vpop.f32.mrf.mxu0  ;;  %v717_v26 = vadd.f32 %v2006_v19, %v1976_v58 }
  0xf0   : > { %v708_v21 = vpop.f32.mrf.mxu1 }
  0xf1   : > { %v2035_v22 = vpop.f32.mrf.mxu0  ;;  %v709_v30 = vadd.f32 %v708_v21, %v443_v60 }
  0xf2   : > { %v2009_v23 = vpop.f32.mrf.mxu1  ;;  %v2352_v31 = vadd.f32 %v2035_v22, %v714_v25 }
  0xf3   : > { %v1006_v24 = vpop.f32.mrf.mxu0  ;;  %v730_v43 = vadd.f32 %v2009_v23, %v1979_v62 }
  0xf4   : > { %v721_v27 = vpop.f32.mrf.mxu1  ;;  %v2361_v35 = vadd.f32 %v1006_v24, %v706_v29 }
  0xf5   : > { %v2036_v28 = vpop.f32.mrf.mxu0  ;;  %v722_v47 = vadd.f32 %v721_v27, %v456_v0 }
  0xf6   : > { %v2010_v32 = vpop.f32.mrf.mxu1  ;;  %v2354_v33 = vadd.f32 %v2036_v28, %v717_v26 }
  0xf7   : > { %v1009_v34 = vpop.f32.mrf.mxu0  ;;  %v733_v44 = vadd.f32 %v2010_v32, %v1980_v2 }
  0xf8   : > { %v1851_v36 = vpack.c.bf16 %v2354_v33, %v2352_v31  ;;  %v724_v37 = vpop.f32.mrf.mxu1  ;;  %v2365_v38 = vadd.f32 %v1009_v34, %v709_v30 }
  0xf9   : > { %v2039_v39 = vpop.f32.mrf.mxu0  ;;  %v725_v49 = vadd.f32 %v724_v37, %v459_v4 }
  0xfa   : > { %1913 = vst [vmem:[%s2359_s29 + $0x8] sm:$0xff] %v1851_v36   ;;  %v1846_v40 = vpack.c.bf16 %v2365_v38, %v2361_v35  ;;  %v2013_v41 = vpop.f32.mrf.mxu1  ;;  %v2371_v51 = vadd.f32 %v2039_v39, %v730_v43 }
  0xfb   : > { %v1022_v42 = vpop.f32.mrf.mxu0  ;;  %v746_v17 = vadd.f32 %v2013_v41, %v1983_v6 }
  0xfc   : > { %1847 = vst [vmem:[%s2359_s29] sm:$0xff] %v1846_v40   ;;  %v737_v45 = vpop.f32.mrf.mxu1  ;;  %v2375_v56 = vadd.f32 %v1022_v42, %v722_v47 }
  0xfd   : > { %v2040_v46 = vpop.f32.mrf.mxu0  ;;  %v738_v23 = vadd.f32 %v737_v45, %v2335_v8 }
  0xfe   : > { %v2014_v52 = vpop.f32.mrf.mxu1  ;;  %v2373_v53 = vadd.f32 %v2040_v46, %v733_v44 }
  0xff   : > { %v1025_v54 = vpop.f32.mrf.mxu0  ;;  %v749_v19 = vadd.f32 %v2014_v52, %v1984_v10 }
 0x100   : > { %v1861_v58 = vpack.c.bf16 %v2373_v53, %v2371_v51  ;;  %v740_v60 = vpop.f32.mrf.mxu1  ;;  %v2379_v62 = vadd.f32 %v1025_v54, %v725_v49 }
 0x101   : > { %v2043_v2 = vpop.f32.mrf.mxu0  ;;  %v741_v24 = vadd.f32 %v740_v60, %v475_v12 }
 0x102   : > { %1915 = vst [vmem:[%s2359_s29 + $0x18] sm:$0xff] %v1861_v58   ;;  %v1856_v0 = vpack.c.bf16 %v2379_v62, %v2375_v56  ;;  %v2017_v4 = vpop.f32.mrf.mxu1  ;;  %v2386_v25 = vadd.f32 %v2043_v2, %v746_v17 }
 0x103   : > { %v1038_v15 = vpop.f32.mrf.mxu0  ;;  %v762_v36 = vadd.f32 %v2017_v4, %v2343_v14 }
 0x104   : > { %1914 = vst [vmem:[%s2359_s29 + $0x10] sm:$0xff] %v1856_v0   ;;  %v753_v21 = vpop.f32.mrf.mxu1  ;;  %v2390_v29 = vadd.f32 %v1038_v15, %v738_v23 }
 0x105   : > { %v2044_v22 = vpop.f32.mrf.mxu0  ;;  %v754_v41 = vadd.f32 %v753_v21, %v2345_v16 }
 0x106   : > { %v2018_v26 = vpop.f32.mrf.mxu1  ;;  %v2388_v27 = vadd.f32 %v2044_v22, %v749_v19 }
 0x107   : > { %v1041_v28 = vpop.f32.mrf.mxu0  ;;  %v765_v37 = vadd.f32 %v2018_v26, %v2347_v18 }
 0x108   : > { %v1871_v6 = vpack.c.bf16 %v2388_v27, %v2386_v25  ;;  %v756_v30 = vpop.f32.mrf.mxu1  ;;  %v2394_v10 = vadd.f32 %v1041_v28, %v741_v24 }
 0x109   : > { %v2047_v32 = vpop.f32.mrf.mxu0  ;;  %v757_v42 = vadd.f32 %v756_v30, %v2349_v20 }
 0x10a   : > { %1917 = vst [vmem:[%s2359_s29 + $0x28] sm:$0xff] %v1871_v6   ;;  %v1866_v8 = vpack.c.bf16 %v2394_v10, %v2390_v29  ;;  %v2021_v12 = vpop.f32.mrf.mxu1  ;;  %v1131_v43 = vadd.f32 %v2047_v32, %v762_v36  ;;  %v1402_v32 = vmul.f32 %v2386_v25, %v2386_v25 }
 0x10b   : > { %v1054_v34 = vpop.f32.mrf.mxu0  ;;  %v778_v2 = vadd.f32 %v2021_v12, %v2317_v55 }
 0x10c   : > { %1916 = vst [vmem:[%s2359_s29 + $0x20] sm:$0xff] %v1866_v8   ;;  %v769_v39 = vpop.f32.mrf.mxu1  ;;  %v1129_v47 = vadd.f32 %v1054_v34, %v754_v41  ;;  %v1406_v58 = vmul.f32 %v1131_v43, %v1131_v43 }
 0x10d   : > { %v2048_v40 = vpop.f32.mrf.mxu0  ;;  %v770_v17 = vadd.f32 %v769_v39, %v2319_v57 }
 0x10e   : > { %v2022_v44 = vpop.f32.mrf.mxu1  ;;  %v1132_v45 = vadd.f32 %v2048_v40, %v765_v37  ;;  %v1404_v19 = vmul.f32 %v1129_v47, %v1129_v47 }
 0x10f   : > { %v1057_v46 = vpop.f32.mrf.mxu0  ;;  %v781_v0 = vadd.f32 %v2022_v44, %v2321_v59  ;;  %v1403_v59 = vmul.f32 %v2388_v27, %v2388_v27 }
 0x110   : > { %v1881_v49 = vpack.c.bf16 %v1132_v45, %v1131_v43  ;;  %v1407_v52 = vmul.f32 %v1132_v45, %v1132_v45  ;;  %v772_v54 = vpop.f32.mrf.mxu1  ;;  %v1130_v14 = vadd.f32 %v1057_v46, %v757_v42  ;;  %1323 = vmatpush1.msra.mxu1 %v1132_v45  ;;  %v1398_v46 = vmul.f32 %v2371_v51, %v2371_v51 }
 0x111   : > { %v2051_v18 = vpop.f32.mrf.mxu0  ;;  %1324 = vmatprep.subr.mxu1 %v2163_v48  ;;  %v773_v22 = vadd.f32 %v772_v54, %v2323_v61 }
 0x112   : > { %1919 = vst [vmem:[%s2359_s29 + $0x38] sm:$0xff] %v1881_v49   ;;  %v1876_v60 = vpack.c.bf16 %v1130_v14, %v1129_v47  ;;  %v2025_v16 = vpop.f32.mrf.mxu1  ;;  %1325 = vmatpush1.msra.mxu1 %v1131_v43  ;;  %1421 = vmatpush1.msra.mxu0 %v1407_v52  ;;  %v1405_v4 = vmul.f32 %v1130_v14, %v1130_v14 }
 0x113   : > { %v1070_v20 = vpop.f32.mrf.mxu0  ;;  %1326 = vmatprep.subr.mxu1 %v2163_v48  ;;  %1422 = vmatprep.subr.mxu0 %v2163_v48  ;;  %v2415_v23 = vadd.f32 %v2051_v18, %v778_v2  ;;  %v794_v36 = vadd.f32 %v2025_v16, %v2325_v63 }
 0x114   : > { %1918 = vst [vmem:[%s2359_s29 + $0x30] sm:$0xff] %v1876_v60   ;;  %v785_v15 = vpop.f32.mrf.mxu1  ;;  %1327 = vmatpush1.msra.mxu1 %v1130_v14  ;;  %1423 = vmatpush1.msra.mxu0 %v1406_v58  ;;  %v2423_v26 = vadd.f32 %v1070_v20, %v770_v17 }
 0x115   : > { %v2052_v21 = vpop.f32.mrf.mxu0  ;;  %1328 = vmatprep.subr.mxu1 %v2163_v48  ;;  %1424 = vmatprep.subr.mxu0 %v2163_v48  ;;  %v786_v40 = vadd.f32 %v785_v15, %v2327_v1 }
 0x116   : > { %v2026_v55 = vpop.f32.mrf.mxu1  ;;  %v2417_v24 = vadd.f32 %v2052_v21, %v781_v0  ;;  %1329 = vmatpush1.msra.mxu1 %v1129_v47  ;;  %1425 = vmatpush1.msra.mxu0 %v1405_v4  ;;  %v1392_v0 = vmul.f32 %v2361_v35, %v2361_v35 }
 0x117   : > { %v1073_v57 = vpop.f32.mrf.mxu0  ;;  %1330 = vmatprep.subr.mxu1 %v2163_v48  ;;  %1426 = vmatprep.subr.mxu0 %v2163_v48  ;;  %v797_v37 = vadd.f32 %v2026_v55, %v2329_v3  ;;  %v1292_v55 = vand.u32 15, %v2313_v50  ;;  %v1408_v50 = vmul.f32 %v2423_v26, %v2423_v26 }
 0x118   : > { %v1891_v61 = vpack.c.bf16 %v2417_v24, %v2415_v23  ;;  %v788_v28 = vpop.f32.mrf.mxu1  ;;  %v2427_v6 = vadd.f32 %v1073_v57, %v773_v22  ;;  %1331 = vmatpush1.msra.mxu1 %v2388_v27  ;;  %1427 = vmatpush1.msra.mxu0 %v1404_v19  ;;  %v1401_v27 = vmul.f32 %v2394_v10, %v2394_v10 }
 0x119   : > { %v2055_v30 = vpop.f32.mrf.mxu0  ;;  %1332 = vmatprep.subr.mxu1 %v2163_v48  ;;  %1428 = vmatprep.subr.mxu0 %v2163_v48  ;;  %v789_v42 = vadd.f32 %v788_v28, %v2331_v5  ;;  %v1411_v22 = vmul.f32 %v2417_v24, %v2417_v24  ;;  %vm1312_vm4 = vcmp.lt.s32.totalorder %v1292_v55, 14 }
 0x11a   : > { %1921 = vst [vmem:[%s2359_s29 + $0x48] sm:$0xff] %v1891_v61   ;;  %v1886_v8 = vpack.c.bf16 %v2427_v6, %v2423_v26  ;;  %v2029_v12 = vpop.f32.mrf.mxu1  ;;  %1333 = vmatpush1.msra.mxu1 %v2386_v25  ;;  %1429 = vmatpush1.msra.mxu0 %v1403_v59  ;;  %v1400_v25 = vmul.f32 %v2390_v29, %v2390_v29 }
 0x11b   : > { %v1086_v34 = vpop.f32.mrf.mxu0  ;;  %1334 = vmatprep.subr.mxu1 %v2163_v48  ;;  %1430 = vmatprep.subr.mxu0 %v2163_v48  ;;  %v2452_v63 = vadd.f32 %v2055_v30, %v794_v36  ;;  %v810_v54 = vadd.f32 %v2029_v12, %v2333_v7  ;;  %v1410_v59 = vmul.f32 %v2415_v23, %v2415_v23 }
 0x11c   : > { %1920 = vst [vmem:[%s2359_s29 + $0x40] sm:$0xff] %v1886_v8   ;;  %v801_v39 = vpop.f32.mrf.mxu1  ;;  %1335 = vmatpush1.msra.mxu1 %v2394_v10  ;;  %1431 = vmatpush1.msra.mxu0 %v1402_v32  ;;  %v1399_v10 = vmul.f32 %v2373_v53, %v2373_v53  ;;  %v2461_v44 = vadd.f32 %v1086_v34, %v786_v40 }
 0x11d   : > { %v2056_v41 = vpop.f32.mrf.mxu0  ;;  %1336 = vmatprep.subr.mxu1 %v2163_v48  ;;  %1432 = vmatprep.subr.mxu0 %v2163_v48  ;;  %v802_v18 = vadd.f32 %v801_v39, %v2337_v9  ;;  %v1414_v17 = vmul.f32 %v2452_v63, %v2452_v63 }
 0x11e   : > { %v2454_v3 = vadd.f32 %v2056_v41, %v797_v37  ;;  %1337 = vmatpush1.msra.mxu1 %v2390_v29  ;;  %1433 = vmatpush1.msra.mxu0 %v1401_v27  ;;  %v2030_v43 = vpop.f32.mrf.mxu1  ;;  %v1412_v21 = vmul.f32 %v2461_v44, %v2461_v44 }
 0x11f   : > { %v1089_v1 = vpop.f32.mrf.mxu0  ;;  %1338 = vmatprep.subr.mxu1 %v2163_v48  ;;  %1434 = vmatprep.subr.mxu0 %v2163_v48  ;;  %v813_v14 = vadd.f32 %v2030_v43, %v2339_v11  ;;  %v1395_v11 = vmul.f32 %v2354_v33, %v2354_v33 }
 0x120   : > { %v1901_v5 = vpack.c.bf16 %v2454_v3, %v2452_v63  ;;  %v2465_v45 = vadd.f32 %v1089_v1, %v789_v42  ;;  %1339 = vmatpush1.msra.mxu1 %v2373_v53  ;;  %1435 = vmatpush1.msra.mxu0 %v1400_v25  ;;  %v804_v49 = vpop.f32.mrf.mxu1  ;;  %v1397_v53 = vmul.f32 %v2379_v62, %v2379_v62 }
 0x121   : > { %v2059_v29 = vpop.f32.mrf.mxu0  ;;  %1340 = vmatprep.subr.mxu1 %v2163_v48  ;;  %1436 = vmatprep.subr.mxu0 %v2163_v48  ;;  %v805_v60 = vadd.f32 %v804_v49, %v2341_v13  ;;  %v1394_v13 = vmul.f32 %v2352_v31, %v2352_v31  ;;  %v1415_v15 = vmul.f32 %v2454_v3, %v2454_v3 }
 0x122   : > { %1923 = vst [vmem:[%s2359_s29 + $0x58] sm:$0xff] %v1901_v5   ;;  %v1896_v47 = vpack.c.bf16 %v2465_v45, %v2461_v44  ;;  %1341 = vmatpush1.msra.mxu1 %v2371_v51  ;;  %1437 = vmatpush1.msra.mxu0 %v1399_v10  ;;  %v1396_v51 = vmul.f32 %v2375_v56, %v2375_v56 }
 0x123   : > { %v1102_v52 = vpop.f32.mrf.mxu0  ;;  %1342 = vmatprep.subr.mxu1 %v2163_v48  ;;  %1438 = vmatprep.subr.mxu0 %v2163_v48  ;;  %v1143_v16 = vadd.f32 %v2059_v29, %v810_v54  ;;  %v1413_v19 = vmul.f32 %v2465_v45, %v2465_v45 }
 0x124   : > { %1922 = vst [vmem:[%s2359_s29 + $0x50] sm:$0xff] %v1896_v47   ;;  %1343 = vmatpush1.msra.mxu1 %v2379_v62  ;;  %1439 = vmatpush1.msra.mxu0 %v1398_v46  ;;  %v1141_v9 = vadd.f32 %v1102_v52, %v802_v18 }
 0x125   : > { %v2060_v58 = vpop.f32.mrf.mxu0  ;;  %1344 = vmatprep.subr.mxu1 %v2163_v48  ;;  %1440 = vmatprep.subr.mxu0 %v2163_v48 }
 0x126   : > { %v1144_v7 = vadd.f32 %v2060_v58, %v813_v14  ;;  %1345 = vmatpush1.msra.mxu1 %v2375_v56  ;;  %1441 = vmatpush1.msra.mxu0 %v1397_v53  ;;  %v1416_v4 = vmul.f32 %v1141_v9, %v1141_v9 }
 0x127   : > { %v1105_v62 = vpop.f32.mrf.mxu0  ;;  %1346 = vmatprep.subr.mxu1 %v2163_v48  ;;  %1442 = vmatprep.subr.mxu0 %v2163_v48 }
 0x128   : > { %v1911_v20 = vpack.c.bf16 %v1144_v7, %v1143_v16  ;;  %v1142_v2 = vadd.f32 %v1105_v62, %v805_v60  ;;  %1347 = vmatpush1.msra.mxu1 %v2354_v33  ;;  %1443 = vmatpush1.msra.mxu0 %v1396_v51  ;;  %v1393_v33 = vmul.f32 %v2365_v38, %v2365_v38 }
 0x129   : > { %1348 = vmatprep.subr.mxu1 %v2163_v48  ;;  %1444 = vmatprep.subr.mxu0 %v2163_v48 }
 0x12a   : > { %1925 = vst [vmem:[%s2359_s29 + $0x68] sm:$0xff] %v1911_v20   ;;  %v1906_v56 = vpack.c.bf16 %v1142_v2, %v1141_v9  ;;  %1349 = vmatpush1.msra.mxu1 %v2352_v31  ;;  %1445 = vmatpush1.msra.mxu0 %v1395_v11  ;;  %v1419_v31 = vmul.f32 %v1144_v7, %v1144_v7 }
 0x12b   : > { %1350 = vmatprep.subr.mxu1 %v2163_v48  ;;  %1446 = vmatprep.subr.mxu0 %v2163_v48 }
 0x12c   : > { %1924 = vst [vmem:[%s2359_s29 + $0x60] sm:$0xff] %v1906_v56   ;;  %1351 = vmatpush1.msra.mxu1 %v2365_v38  ;;  %1447 = vmatpush1.msra.mxu0 %v1394_v13  ;;  %v1418_v38 = vmul.f32 %v1143_v16, %v1143_v16 }
 0x12d   : > { %1352 = vmatprep.subr.mxu1 %v2163_v48  ;;  %1448 = vmatprep.subr.mxu0 %v2163_v48 }
 0x12e   : > { %1353 = vmatpush1.msra.mxu1 %v2361_v35  ;;  %1449 = vmatpush1.msra.mxu0 %v1393_v33  ;;  %v1417_v35 = vmul.f32 %v1142_v2, %v1142_v2 }
 0x12f   : > { %1362 = vmatprep.subr.mxu1 %v2163_v48  ;;  %1450 = vmatprep.subr.mxu0 %v2163_v48 }
 0x130   : > { %1363 = vmatpush2.msra.mxu1 %v1144_v7  ;;  %1451 = vmatpush1.msra.mxu0 %v1392_v0 }
 0x131   : > { %1364 = vmatprep.subr.mxu1 %v2163_v48  ;;  %1460 = vmatprep.subr.mxu0 %v2163_v48 }
 0x132   : > { %1365 = vmatpush2.msra.mxu1 %v1143_v16  ;;  %1461 = vmatpush2.msra.mxu0 %v1419_v31 }
 0x133   : > { %1366 = vmatprep.subr.mxu1 %v2163_v48  ;;  %1462 = vmatprep.subr.mxu0 %v2163_v48 }
 0x134   : > { %1367 = vmatpush2.msra.mxu1 %v1142_v2  ;;  %1463 = vmatpush2.msra.mxu0 %v1418_v38 }
 0x135   : > { %1368 = vmatprep.subr.mxu1 %v2163_v48  ;;  %1464 = vmatprep.subr.mxu0 %v2163_v48 }
 0x136   : > { %1369 = vmatpush2.msra.mxu1 %v1141_v9  ;;  %1465 = vmatpush2.msra.mxu0 %v1417_v35 }
 0x137   : > { %1370 = vmatprep.subr.mxu1 %v2163_v48  ;;  %1466 = vmatprep.subr.mxu0 %v2163_v48 }
 0x138   : > { %1371 = vmatpush2.msra.mxu1 %v2454_v3  ;;  %1467 = vmatpush2.msra.mxu0 %v1416_v4 }
 0x139   : > { %1372 = vmatprep.subr.mxu1 %v2163_v48  ;;  %1468 = vmatprep.subr.mxu0 %v2163_v48 }
 0x13a   : > { %1373 = vmatpush2.msra.mxu1 %v2452_v63  ;;  %1469 = vmatpush2.msra.mxu0 %v1415_v15 }
 0x13b   : > { %1374 = vmatprep.subr.mxu1 %v2163_v48  ;;  %1470 = vmatprep.subr.mxu0 %v2163_v48 }
 0x13c   : > { %1375 = vmatpush2.msra.mxu1 %v2465_v45  ;;  %1471 = vmatpush2.msra.mxu0 %v1414_v17 }
 0x13d   : > { %1376 = vmatprep.subr.mxu1 %v2163_v48  ;;  %1472 = vmatprep.subr.mxu0 %v2163_v48 }
 0x13e   : > { %1377 = vmatpush2.msra.mxu1 %v2461_v44  ;;  %1473 = vmatpush2.msra.mxu0 %v1413_v19 }
 0x13f   : > { %1378 = vmatprep.subr.mxu1 %v2163_v48  ;;  %1474 = vmatprep.subr.mxu0 %v2163_v48 }
 0x140   : > { %1379 = vmatpush2.msra.mxu1 %v2417_v24  ;;  %1475 = vmatpush2.msra.mxu0 %v1412_v21  ;;  %v1409_v24 = vmul.f32 %v2427_v6, %v2427_v6 }
 0x141   : > { %1380 = vmatprep.subr.mxu1 %v2163_v48  ;;  %1476 = vmatprep.subr.mxu0 %v2163_v48 }
 0x142   : > { %1381 = vmatpush2.msra.mxu1 %v2415_v23  ;;  %1477 = vmatpush2.msra.mxu0 %v1411_v22  ;;  %v2164_v23 = vmov 1.0  }
 0x143   : > { %1382 = vmatprep.subr.mxu1 %v2163_v48  ;;  %1478 = vmatprep.subr.mxu0 %v2163_v48 }
 0x144   : > { %1383 = vmatpush2.msra.mxu1 %v2427_v6  ;;  %1479 = vmatpush2.msra.mxu0 %v1410_v59 }
 0x145   : > { %1384 = vmatprep.subr.mxu1 %v2163_v48  ;;  %1480 = vmatprep.subr.mxu0 %v2163_v48 }
 0x146   : > { %1385 = vmatpush2.msra.mxu1 %v2423_v26  ;;  %1481 = vmatpush2.msra.mxu0 %v1409_v24  ;;  %v1490_v26 = vld [vmem:[%s206_s6] sm:$0x3] }
 0x147   : > { %1482 = vmatprep.subr.mxu0 %v2163_v48  ;;  %1809 = vmatmul.mubr.msk.f32.vlgmr.msra.gmra.mxu1 %vm1312_vm4, %v2164_v23 }
 0x148   : > { %1483 = vmatpush2.msra.mxu0 %v1408_v50 }
 0x149   : > { %1811 = vmatmul.mubr.msk.f32.vlgmr.msra.gmra.mxu0 %vm1312_vm4, %v2164_v23 }
 0x207   : > { %v1388_v57 = vpop.f32.mrf.mxu1 }
 0x209   : > { %v1486_v61 = vpop.f32.mrf.mxu0  ;;  %v1390_v28 = vpop.f32.mrf.mxu1 }
 0x20a   : > { %v1492_v6 = vrot.slane %v1486_v61, 7 }
 0x20b   : > { %v1488_v30 = vpop.f32.mrf.mxu0 }
 0x20c   : > { %v1495_v32 = vsel %vm1494_vm5, %v1388_v57, %v1492_v6 }
 0x20d   : > { %v1496_v8 = vadd.f32 %v1495_v32, %v1490_v26 }
 0x20f   : > { %1497 = vst [vmem:[%s206_s6] sm:$0x3] %v1496_v8 }
 0x210 PF: > { %s14_s14 = sadd.s32 1, %s2161_s14   ;;  %s2581_s12 = smov %s2157_s13 }
 0x211   : > { %p11_p5 = scmp.ge.s32.totalorder %s14_s14, 4   ;;  %s2582_s13 = smov %s2584_s15 }
 0x213   :  { %13 = sbr.rel (!%p11_p5) target bundleno = 2 (0x2), region = 79 }

</bundles_post_ra>
